<compile_context>
chip_gen: v6e
topology: v6e:2x2x1
jax: 0.10.0
libtpu: 0.0.40
codegen_flags: <defaults>
</compile_context>

<pallas_src>
import jax
import jax.numpy as jnp
from jax.experimental import pallas as pl
from jax.experimental.pallas import tpu as pltpu


# ---------------------------------------------------------------------------
# Kernels
# ---------------------------------------------------------------------------

def _pool_sum_kernel(x_ref, s_ref):
    """Accumulate per-row spatial sums across the HW grid axis (axis 1)."""
    @pl.when(pl.program_id(1) == 0)
    def _():
        s_ref[...] = jnp.zeros_like(s_ref)

    s_ref[...] += jnp.sum(x_ref[...].astype(jnp.float32), axis=-1, keepdims=True)


def _scale_rows_kernel(x_ref, y_ref, o_ref):
    """out[r, :] = x[r, :] * y[r]  (lane-dense tiles, pure VPU multiply)."""
    o_ref[...] = (x_ref[...].astype(jnp.float32) * y_ref[...]).astype(o_ref.dtype)


# ---------------------------------------------------------------------------
# Wrapper
# ---------------------------------------------------------------------------

def _pick_tile(dim, quantum, max_tile):
    """Largest divisor of `dim` that is a multiple of `quantum` and <= max_tile.
    Falls back to the full dim (always a legal block size)."""
    if dim % quantum != 0:
        return dim
    best = quantum
    t = quantum
    limit = min(dim, max_tile)
    while t <= limit:
        if dim % t == 0:
            best = t
        t += quantum
    return best


def ca_layer_pallas(x, params, *, rows_tile_max=256, hw_tile_max=2048):
    """x: (B, C, H, W) NCHW. params: (w1,b1,w2,b2,w3,b3,w4,b4),
    wi shaped (out_c, in_c) like a squeezed PyTorch Conv2d 1x1 weight, bi (C,)."""
    B, C, H, W = x.shape
    HW = H * W
    R = B * C
    w1, b1, w2, b2, w3, b3, w4, b4 = params

    x2 = x.reshape(R, HW)

    # Tile sizes: sublane quantum 8, lane quantum 128; capped so that
    # double-buffered in+out tiles fit comfortably in scoped VMEM on v7x too.
    rt = _pick_tile(R, 8, rows_tile_max)
    ht = _pick_tile(HW, 128, hw_tile_max)
    grid = (R // rt, HW // ht)

    # ---- Pass 1: tiled global sum over the spatial (lane) axis -> (R, 1) f32.
    sums = pl.pallas_call(
        _pool_sum_kernel,
        out_shape=jax.ShapeDtypeStruct((R, 1), jnp.float32),
        grid=grid,
        in_specs=[pl.BlockSpec((rt, ht), lambda i, j: (i, j))],
        out_specs=pl.BlockSpec((rt, 1), lambda i, j: (i, 0)),
        compiler_params=pltpu.CompilerParams(
            dimension_semantics=("parallel", "arbitrary")),
    )(x2)

    # ---- Tiny per-image MLP + softmax in plain XLA (4x4 matmuls; keeping them
    #      out of the hot kernel is what lets the multiply pass be pipelined).
    y = sums.reshape(B, C) * (1.0 / HW)                 # AdaptiveAvgPool2d(1)
    y = jax.nn.relu(y @ w1.T + b1)
    y = jax.nn.relu(y @ w2.T + b2)
    y = jax.nn.relu(y @ w3.T + b3)
    y = y @ w4.T + b4
    y = jax.nn.softmax(y, axis=-1)                      # nn.Softmax() -> channel dim
    y2 = y.reshape(R, 1).astype(jnp.float32)

    # ---- Pass 2: tiled, pipelined, lane-dense broadcast multiply.
    out2 = pl.pallas_call(
        _scale_rows_kernel,
        out_shape=jax.ShapeDtypeStruct((R, HW), x.dtype),
        grid=grid,
        in_specs=[pl.BlockSpec((rt, ht), lambda i, j: (i, j)),
                  pl.BlockSpec((rt, 1), lambda i, j: (i, 0))],
        out_specs=pl.BlockSpec((rt, ht), lambda i, j: (i, j)),
        compiler_params=pltpu.CompilerParams(
            dimension_semantics=("parallel", "parallel")),
    )(x2, y2)

    return out2.reshape(B, C, H, W)


# ---------------------------------------------------------------------------
# Pure-JAX reference matching the PyTorch forward
# ---------------------------------------------------------------------------

def ca_layer_ref(x, params):
    w1, b1, w2, b2, w3, b3, w4, b4 = params
    y = jnp.mean(x, axis=(2, 3))                        # avg pool -> (B, C)
    y = jax.nn.relu(y @ w1.T + b1)
    y = jax.nn.relu(y @ w2.T + b2)
    y = jax.nn.relu(y @ w3.T + b3)
    y = y @ w4.T + b4
    y = jax.nn.softmax(y, axis=-1)                      # softmax over channels
    return x * y[:, :, None, None]


if __name__ == "__main__":
    B, C, H, W = 2, 4, 16, 16      # channel=4, reduction=1
    key = jax.random.PRNGKey(0)
    keys = jax.random.split(key, 9)

    x = jax.random.normal(keys[0], (B, C, H, W), dtype=jnp.float32)

    # Deterministic synthetic parameters (Conv2d(C, C, 1) -> weight (C, C), bias (C,))
    def make_wb(kw, kb):
        w = 0.3 * jax.random.normal(kw, (C, C), dtype=jnp.float32)
        b = 0.1 * jax.random.normal(kb, (C,), dtype=jnp.float32)
        return w, b

    w1, b1 = make_wb(keys[1], keys[2])
    w2, b2 = make_wb(keys[3], keys[4])
    w3, b3 = make_wb(keys[5], keys[6])
    w4, b4 = make_wb(keys[7], keys[8])
    params = (w1, b1, w2, b2, w3, b3, w4, b4)

    out = jax.block_until_ready(ca_layer_pallas(x, params))
    ref = ca_layer_ref(x, params)

    assert out.shape == (B, C, H, W)
    assert jnp.allclose(out, ref, atol=1e-5, rtol=1e-5), "mismatch vs reference"

    print("KERNEL_OK")
</pallas_src>

<mosaic_0001>
module attributes {stable_mosaic.version = 11 : i64} {
  func.func @_pool_sum_kernel(%arg0: i32, %arg1: i32, %arg2: memref<8x256xf32, #tpu.memory_space<vmem>>, %arg3: memref<8x1xf32, #tpu.memory_space<vmem>>) attributes {dimension_semantics = [#tpu.dimension_semantics<parallel>, #tpu.dimension_semantics<arbitrary>], iteration_bounds = array<i64: 1, 1>, scalar_prefetch = 0 : i64, scratch_operands = 0 : i64, tpu.core_type = #tpu.core_type<tc>, window_params = [{transform_indices = @transform_0, window_bounds = array<i64: 8, 256>}, {transform_indices = @transform_1, window_bounds = array<i64: 8, 1>}]} {
    %c0_i32 = arith.constant 0 : i32
    %0 = arith.cmpi eq, %arg1, %c0_i32 : i32
    %1 = arith.extui %0 : i1 to i32
    %c0_i32_0 = arith.constant 0 : i32
    %2 = arith.cmpi ne, %1, %c0_i32_0 : i32
    scf.if %2 {
      %cst_6 = arith.constant 0.000000e+00 : f32
      %9 = vector.broadcast %cst_6 : f32 to vector<8x1xf32>
      %c0_7 = arith.constant 0 : index
      %c0_8 = arith.constant 0 : index
      %10 = vector.load %arg3[%c0_7, %c0_8] : memref<8x1xf32, #tpu.memory_space<vmem>>, vector<8x1xf32>
      tpu.vector_store %arg3[%c0_7, %c0_8], %9 {strides = array<i32>} : memref<8x1xf32, #tpu.memory_space<vmem>>, vector<8x1xf32>,
    } else {
    }
    %c0 = arith.constant 0 : index
    %c0_1 = arith.constant 0 : index
    %3 = vector.load %arg3[%c0, %c0_1] : memref<8x1xf32, #tpu.memory_space<vmem>>, vector<8x1xf32>
    %c0_2 = arith.constant 0 : index
    %c0_3 = arith.constant 0 : index
    %4 = vector.load %arg2[%c0_2, %c0_3] : memref<8x256xf32, #tpu.memory_space<vmem>>, vector<8x256xf32>
    %cst = arith.constant dense<0.000000e+00> : vector<8xf32>
    %5 = vector.multi_reduction <add>, %4, %cst [1] : vector<8x256xf32> to vector<8xf32>
    %6 = vector.shape_cast %5 : vector<8xf32> to vector<8x1xf32>
    %7 = arith.addf %3, %6 : vector<8x1xf32>
    %c0_4 = arith.constant 0 : index
    %c0_5 = arith.constant 0 : index
    %8 = vector.load %arg3[%c0_4, %c0_5] : memref<8x1xf32, #tpu.memory_space<vmem>>, vector<8x1xf32>
    tpu.vector_store %arg3[%c0_4, %c0_5], %7 {strides = array<i32>} : memref<8x1xf32, #tpu.memory_space<vmem>>, vector<8x1xf32>,
    return
  }
  func.func @transform_0(%arg0: i32, %arg1: i32) -> (i32, i32) {
    %c0_i32 = arith.constant 0 : i32
    return %arg0, %arg1 : i32, i32
  }
  func.func @transform_1(%arg0: i32, %arg1: i32) -> (i32, i32) {
    %c0_i32 = arith.constant 0 : i32
    %c0_i32_0 = arith.constant 0 : i32
    return %arg0, %c0_i32 : i32, i32
  }
}

</mosaic_0001>

<bundles_post_ra>
// kernel: tpu_custom_call.1
= control target key start
LH: loop header
LB: loop body
LE: loop exit
PB: predicated region body
PF: predicated region fallthrough
CT: control target
= control target key end

     0   :  { %6 = vsyncpa [#allocation3], 0  ;;  %s64_s6 = smov [#allocation2]   ;;  %s88_s0 = inlined_call_operand.hbm [shape: f32[8,256], index: 0, kind: input, shape index: {}]   ;;  %s89_s1 = inlined_call_operand.vmem [shape: f32[8,1], index: 1, kind: output, shape index: {}]  }
   0x1   :  { %s13_s7 = sshll.u32 %s64_s6, 4  ;;  %s14_s7 = int_to_ptr.vmem [resolvable:$true] %s13_s7 }
   0x2   :  { %s50_s8 = scalar_lea.vmem %s14_s7, 256  ;;  %p55_p1 = scmp.lt.s32.totalorder %s14_s7, %s14_s7 }
   0x3   :  { %p51_p0 = scmp.ne.s32.totalorder %s14_s7, %s50_s8  ;;  %p56_p2 = scmp.lt.s32.totalorder %s50_s8, %s50_s8 }
   0x5   :  { %p57_p3 = por %p56_p2, %p55_p1 }
   0x7   :  { %p58_p4 = pnand %p57_p3, %p51_p0 }
   0x9   :  { %61 = shalt.err (!%p58_p4)
}
   0xa   :  { %16 = dma.hbm_to_vmem [thread:$0]  %s88_s0, 256, %s14_s7, [#allocation3]  }
   0xb   :  { %62 = dma.done.wait [#allocation3], 256  }
   0xc   :  { %63 = vsyncadd [#allocation3], 4294967040  ;;  %vm24_vm0 = vcmask 7168   ;;  %v65_v0 = vmov 0.0   ;;  %v27_v1 = vld [vmem:[#allocation2] sm:$0xff]  ;;  %v28_v2 = vld [vmem:[#allocation2 + $0x8] sm:$0xff] }
   0xd   :  { %25 = vst.msk [vmem:[%s89_s1] sm:$0xff] %vm24_vm0, %v65_v0  ;;  %v29_v3 = vadd.f32 %v28_v2, %v27_v1 }
   0xf   :  { %30 = vadd.xlane.f32.xlu0 %v29_v3 }
  0x14   :  { %v26_v4 = vld [vmem:[%s89_s1] sm:$0xff] }
  0x98   :  { %v31_v5 = vpop.xlane.xlu0 %30 }
  0x99   :  { %v32_v6 = vadd.f32 %v31_v5, %v26_v4 }
  0x9b   :  { %34 = vst.msk [vmem:[%s89_s1] sm:$0xff] %vm24_vm0, %v32_v6 }
  0x9c   :  { %39 = vsyncpa [#allocation3], 1 }

</bundles_post_ra>
